<compile_context>
chip_gen: v7x
topology: tpu7x:2x2x1
jax: 0.10.0
libtpu: 0.0.40
codegen_flags: <defaults>
</compile_context>

<pallas_src>
import jax
import jax.numpy as jnp
from jax.experimental import pallas as pl
from jax.experimental.pallas import tpu as pltpu

# ---------------- configuration (small synthetic shapes) ----------------
IN_FEATURES = 16   # TestDHNArch in_features
HIDDEN = 16        # linear0 out_features
OUT = 16           # linear1 out_features
BATCH = 256        # batch rows (small, but enough for a 2-step grid)
BM = 128           # batch tile per grid step


def dhn_kernel(x_ref, w_ref, b_ref, out_ref):
    # Single fused affine: out = x @ w_fold + b_fold.
    # x / w_fold are bf16 (MXU-native); accumulate in f32; bias add + store in f32.
    acc = jnp.dot(x_ref[...], w_ref[...], preferred_element_type=jnp.float32)
    out_ref[...] = acc + b_ref[...]


def test_dhn_forward(x, w0, b0, w1, b1):
    """x: (B, IN). w0: (HIDDEN, IN), b0: (HIDDEN,), w1: (OUT, HIDDEN), b1: (OUT,)
    (PyTorch nn.Linear stores weight as (out_features, in_features))."""
    # One-time parameter fold (no activation between the two Linears).
    w_fold = (w0.T @ w1.T).astype(jnp.bfloat16)        # (IN, OUT)
    b_fold = (b0 @ w1.T + b1).reshape(1, OUT)          # (1, OUT) f32
    xb = x.astype(jnp.bfloat16)

    grid = (BATCH // BM,)
    return pl.pallas_call(
        dhn_kernel,
        out_shape=jax.ShapeDtypeStruct((BATCH, OUT), jnp.float32),
        grid=grid,
        in_specs=[
            pl.BlockSpec((BM, IN_FEATURES), lambda i: (i, 0)),     # batch tile
            pl.BlockSpec((IN_FEATURES, OUT), lambda i: (0, 0)),    # weight, resident
            pl.BlockSpec((1, OUT), lambda i: (0, 0)),              # bias, resident
        ],
        out_specs=pl.BlockSpec((BM, OUT), lambda i: (i, 0)),
        compiler_params=pltpu.CompilerParams(
            dimension_semantics=("parallel",)),                    # 2x on v7x dual-TC
    )(xb, w_fold, b_fold)


def reference_forward(x, w0, b0, w1, b1):
    # Unfolded f32 reference matching the PyTorch module exactly.
    h = x @ w0.T + b0
    return h @ w1.T + b1


if __name__ == "__main__":
    key = jax.random.PRNGKey(0)
    kx, k0w, k0b, k1w, k1b = jax.random.split(key, 5)

    # Deterministic input and nn.Linear-style parameter init.
    x = jax.random.uniform(kx, (BATCH, IN_FEATURES), dtype=jnp.float32)
    lim0 = 1.0 / (IN_FEATURES ** 0.5)
    w0 = jax.random.uniform(k0w, (HIDDEN, IN_FEATURES), jnp.float32, -lim0, lim0)
    b0 = jax.random.uniform(k0b, (HIDDEN,), jnp.float32, -lim0, lim0)
    lim1 = 1.0 / (HIDDEN ** 0.5)
    w1 = jax.random.uniform(k1w, (OUT, HIDDEN), jnp.float32, -lim1, lim1)
    b1 = jax.random.uniform(k1b, (OUT,), jnp.float32, -lim1, lim1)

    out = jax.block_until_ready(test_dhn_forward(x, w0, b0, w1, b1))
    ref = reference_forward(x, w0, b0, w1, b1)

    assert out.shape == (BATCH, OUT)
    # Tolerance loosened (per review) because operands are cast to bf16 on the MXU.
    assert jnp.allclose(out, ref, atol=2e-2, rtol=2e-2), float(jnp.max(jnp.abs(out - ref)))

    print("KERNEL_OK")
</pallas_src>

<mosaic_0001>
module attributes {stable_mosaic.version = 11 : i64} {
  func.func @dhn_kernel(%arg0: i32, %arg1: memref<128x16xbf16, #tpu.memory_space<vmem>>, %arg2: memref<16x16xbf16, #tpu.memory_space<vmem>>, %arg3: memref<1x16xf32, #tpu.memory_space<vmem>>, %arg4: memref<128x16xf32, #tpu.memory_space<vmem>>) attributes {dimension_semantics = [#tpu.dimension_semantics<parallel>], iteration_bounds = array<i64: 2>, scalar_prefetch = 0 : i64, scratch_operands = 0 : i64, tpu.core_type = #tpu.core_type<tc>, window_params = [{transform_indices = @transform_0, window_bounds = array<i64: 128, 16>}, {pipeline_mode = #tpu.pipeline_mode<synchronous>, transform_indices = @transform_1, window_bounds = array<i64: 16, 16>}, {pipeline_mode = #tpu.pipeline_mode<synchronous>, transform_indices = @transform_2, window_bounds = array<i64: 1, 16>}, {transform_indices = @transform_3, window_bounds = array<i64: 128, 16>}]} {
    %c0 = arith.constant 0 : index
    %c0_0 = arith.constant 0 : index
    %0 = vector.load %arg1[%c0, %c0_0] : memref<128x16xbf16, #tpu.memory_space<vmem>>, vector<128x16xbf16>
    %c0_1 = arith.constant 0 : index
    %c0_2 = arith.constant 0 : index
    %1 = vector.load %arg2[%c0_1, %c0_2] : memref<16x16xbf16, #tpu.memory_space<vmem>>, vector<16x16xbf16>
    %cst = arith.constant dense<0.000000e+00> : vector<128x16xf32>
    %2 = tpu.matmul %0, %1, %cst {dimension_numbers = #tpu.dot_dimension_numbers<[1], [0], [0], [1], [0, 0, 1, 1], [], []>} : vector<128x16xbf16>, vector<16x16xbf16>, vector<128x16xf32> -> vector<128x16xf32>
    %c0_3 = arith.constant 0 : index
    %c0_4 = arith.constant 0 : index
    %3 = vector.load %arg3[%c0_3, %c0_4] : memref<1x16xf32, #tpu.memory_space<vmem>>, vector<1x16xf32>
    %4 = vector.broadcast %3 : vector<1x16xf32> to vector<128x16xf32>
    %5 = arith.addf %2, %4 : vector<128x16xf32>
    %c0_5 = arith.constant 0 : index
    %c0_6 = arith.constant 0 : index
    %6 = vector.load %arg4[%c0_5, %c0_6] : memref<128x16xf32, #tpu.memory_space<vmem>>, vector<128x16xf32>
    tpu.vector_store %arg4[%c0_5, %c0_6], %5 {strides = array<i32>} : memref<128x16xf32, #tpu.memory_space<vmem>>, vector<128x16xf32>,
    return
  }
  func.func @transform_0(%arg0: i32) -> (i32, i32) {
    %c0_i32 = arith.constant 0 : i32
    %c0_i32_0 = arith.constant 0 : i32
    return %arg0, %c0_i32 : i32, i32
  }
  func.func @transform_1(%arg0: i32) -> (i32, i32) {
    %c0_i32 = arith.constant 0 : i32
    %c0_i32_0 = arith.constant 0 : i32
    %c0_i32_1 = arith.constant 0 : i32
    return %c0_i32, %c0_i32_0 : i32, i32
  }
  func.func @transform_2(%arg0: i32) -> (i32, i32) {
    %c0_i32 = arith.constant 0 : i32
    %c0_i32_0 = arith.constant 0 : i32
    %c0_i32_1 = arith.constant 0 : i32
    return %c0_i32, %c0_i32_0 : i32, i32
  }
  func.func @transform_3(%arg0: i32) -> (i32, i32) {
    %c0_i32 = arith.constant 0 : i32
    %c0_i32_0 = arith.constant 0 : i32
    return %arg0, %c0_i32 : i32, i32
  }
}

</mosaic_0001>

<bundles_post_ra>
// kernel: tpu_custom_call.1
= control target key start
LH: loop header
LB: loop body
LE: loop exit
PB: predicated region body
PF: predicated region fallthrough
CT: control target
= control target key end

     0   :  { %s543_s12 = smov 0   ;;  %s608_s0 = inlined_call_operand.vmem [shape: bf16[256,16], index: 0, kind: input, shape index: {}]   ;;  %s609_s1 = inlined_call_operand.vmem [shape: bf16[16,16], index: 1, kind: input, shape index: {}]   ;;  %s610_s2 = inlined_call_operand.vmem [shape: f32[1,16], index: 2, kind: input, shape index: {}]   ;;  %s611_s3 = inlined_call_operand.vmem [shape: f32[256,16], index: 3, kind: output, shape index: {}]  }
   0x1 LB: > { %s440_s13 = sadd.s32 4294967295, %s521_s12   ;;  %p444_p0 = scmp.ge.s32.totalorder %s521_s12, 1  ;;  %s521_s12 = sphi %s543_s12, %s13_s12  }
   0x2   : > { %p138_p1 = scmp.lt.s32.totalorder %s521_s12, 3 }
   0x4   : > { %p139_p2 = pnand %p444_p0, %p138_p1 }
   0x5   : > { %v506_v0 = vld [vmem:[%s609_s1] sm:$0xff] (!%p139_p2)   ;;  %s445_s16 = sshll.u32 (!%p139_p2), %s440_s13, 4  ;;  %vm246_vm0 = vcmask (!%p139_p2), 130048  }
   0x6   : > { %142 = sbr.rel (%p139_p2) target bundleno = 245 (0xf5), region = 32  ;;  %p163_p3 = scmp.lt.s32.totalorder (!%p139_p2), %s445_s16, 31  ;;  %478 = vmatprep.subr.bf16.mxu0 (!%p139_p2), %v506_v0  ;;  %496 = vmatprep.subr.bf16.mxu1 (!%p139_p2), %v506_v0  ;;  %v449_v9 = vld [vmem:[%s610_s2] ss:$0 sm:$0xff] (!%p139_p2) }
   0x7   : > { %479 = vmatpush3.bf16.msra.mxu0 (!%p139_p2), %v506_v0  ;;  %497 = vmatpush3.bf16.msra.mxu1 (!%p139_p2), %v506_v0 }
   0xd   : > { %s613_s16 = smov (!%p163_p3, %s445_s16), 31 }
   0xe   : > { %s446_s17 = sshll.u32 %s613_s16, 2  ;;  %s448_s21 = sshll.u32 %s613_s16, 3 }
   0xf   : > { %s166_s20 = scalar_lea.vmem %s608_s0, %s446_s17  ;;  %s571_s26 = scalar_lea.vmem %s611_s3, %s448_s21 }
  0x10   : > { %v507_v1 = vld [vmem:[%s166_s20] sm:$0xff]   ;;  %v509_v3 = vld [vmem:[%s166_s20 + $0x8] sm:$0xff]   ;;  %v511_v5 = vld [vmem:[%s166_s20 + $0x10] sm:$0xff]  }
  0x11   : > { %v508_v2 = vld [vmem:[%s166_s20 + $0x20] sm:$0xff]   ;;  %480 = vmatprep.mubr.msk.bf16.mxu0 %vm246_vm0, %v507_v1  ;;  %v510_v4 = vld [vmem:[%s166_s20 + $0x28] sm:$0xff]   ;;  %v512_v6 = vld [vmem:[%s166_s20 + $0x30] sm:$0xff]  }
  0x12   : > { %488 = vmatprep.mubr.msk.bf16.mxu1 %vm246_vm0, %v508_v2  ;;  %481 = vmatmul.mubr.msk.bf16.vlgmr.msra.gmra.mrb[0].mxu0 %vm246_vm0, %v509_v3  ;;  %v513_v7 = vld [vmem:[%s166_s20 + $0x18] sm:$0xff]  }
  0x13   : > { %489 = vmatmul.mubr.msk.bf16.vlgmr.msra.gmra.mrb[0].mxu1 %vm246_vm0, %v510_v4  ;;  %484 = vmatprep.mubr.msk.bf16.mxu0 %vm246_vm0, %v511_v5  ;;  %v514_v8 = vld [vmem:[%s166_s20 + $0x38] sm:$0xff]  }
  0x14   : > { %492 = vmatprep.mubr.msk.bf16.mxu1 %vm246_vm0, %v512_v6 }
  0x1a   : > { %485 = vmatmul.mubr.msk.bf16.gmra.mrb[4].mxu0 %vm246_vm0, %v513_v7 }
  0x1b   : > { %493 = vmatmul.mubr.msk.bf16.gmra.mrb[4].mxu1 %vm246_vm0, %v514_v8 }
  0xe5   : > { %v482_v10 = vpop.f32.mrb[0].mxu0 }
  0xe6   : > { %v314_v11 = vadd.f32 %v482_v10, %v449_v9  ;;  %v490_v12 = vpop.f32.mrb[0].mxu1  ;;  %v305_v13 = vpop.f32.mrb[1].mxu0 }
  0xe7   : > { %v346_v14 = vadd.f32 %v490_v12, %v449_v9  ;;  %v306_v15 = vadd.f32 %v449_v9, %v305_v13  ;;  %v337_v16 = vpop.f32.mrb[1].mxu1  ;;  %v483_v17 = vpop.f32.mrb[2].mxu0 }
  0xe8   : > { %370 = vst.msk [vmem:[%s571_s26 + $0x10] sm:$0xff] %vm246_vm0, %v314_v11  ;;  %v338_v18 = vadd.f32 %v449_v9, %v337_v16  ;;  %v317_v19 = vadd.f32 %v483_v17, %v449_v9  ;;  %v491_v20 = vpop.f32.mrb[2].mxu1  ;;  %v308_v21 = vpop.f32.mrb[3].mxu0 }
  0xe9   : > { %378 = vst.msk [vmem:[%s571_s26 + $0x50] sm:$0xff] %vm246_vm0, %v346_v14  ;;  %368 = vst.msk [vmem:[%s571_s26] sm:$0xff] %vm246_vm0, %v306_v15  ;;  %v349_v22 = vadd.f32 %v491_v20, %v449_v9  ;;  %v309_v23 = vadd.f32 %v449_v9, %v308_v21  ;;  %v340_v24 = vpop.f32.mrb[3].mxu1 }
  0xea   : > { %376 = vst.msk [vmem:[%s571_s26 + $0x40] sm:$0xff] %vm246_vm0, %v338_v18  ;;  %371 = vst.msk [vmem:[%s571_s26 + $0x18] sm:$0xff] %vm246_vm0, %v317_v19  ;;  %v341_v25 = vadd.f32 %v449_v9, %v340_v24 }
  0xeb   : > { %379 = vst.msk [vmem:[%s571_s26 + $0x58] sm:$0xff] %vm246_vm0, %v349_v22  ;;  %369 = vst.msk [vmem:[%s571_s26 + $0x8] sm:$0xff] %vm246_vm0, %v309_v23 }
  0xec   : > { %377 = vst.msk [vmem:[%s571_s26 + $0x48] sm:$0xff] %vm246_vm0, %v341_v25 }
  0xed   : > { %v486_v26 = vpop.f32.mrb[4].mxu0 }
  0xee   : > { %v330_v27 = vadd.f32 %v486_v26, %v449_v9  ;;  %v494_v28 = vpop.f32.mrb[4].mxu1  ;;  %v321_v29 = vpop.f32.mrb[5].mxu0 }
  0xef   : > { %v362_v30 = vadd.f32 %v494_v28, %v449_v9  ;;  %v322_v31 = vadd.f32 %v449_v9, %v321_v29  ;;  %v353_v32 = vpop.f32.mrb[5].mxu1  ;;  %v487_v33 = vpop.f32.mrb[6].mxu0 }
  0xf0   : > { %374 = vst.msk [vmem:[%s571_s26 + $0x30] sm:$0xff] %vm246_vm0, %v330_v27  ;;  %v354_v34 = vadd.f32 %v449_v9, %v353_v32  ;;  %v333_v35 = vadd.f32 %v487_v33, %v449_v9  ;;  %v495_v36 = vpop.f32.mrb[6].mxu1  ;;  %v324_v37 = vpop.f32.mrb[7].mxu0 }
  0xf1   : > { %382 = vst.msk [vmem:[%s571_s26 + $0x70] sm:$0xff] %vm246_vm0, %v362_v30  ;;  %372 = vst.msk [vmem:[%s571_s26 + $0x20] sm:$0xff] %vm246_vm0, %v322_v31  ;;  %v365_v38 = vadd.f32 %v495_v36, %v449_v9  ;;  %v325_v39 = vadd.f32 %v449_v9, %v324_v37  ;;  %v356_v40 = vpop.f32.mrb[7].mxu1 }
  0xf2   : > { %380 = vst.msk [vmem:[%s571_s26 + $0x60] sm:$0xff] %vm246_vm0, %v354_v34  ;;  %375 = vst.msk [vmem:[%s571_s26 + $0x38] sm:$0xff] %vm246_vm0, %v333_v35  ;;  %v357_v41 = vadd.f32 %v449_v9, %v356_v40 }
  0xf3   : > { %383 = vst.msk [vmem:[%s571_s26 + $0x78] sm:$0xff] %vm246_vm0, %v365_v38  ;;  %373 = vst.msk [vmem:[%s571_s26 + $0x28] sm:$0xff] %vm246_vm0, %v325_v39 }
  0xf4   : > { %381 = vst.msk [vmem:[%s571_s26 + $0x68] sm:$0xff] %vm246_vm0, %v357_v41 }
  0xf5 PF: > { %s13_s12 = sadd.s32 1, %s521_s12  }
  0xf6   : > { %p10_p4 = scmp.ge.s32.totalorder %s13_s12, 4  }
  0xf8   :  { %12 = sbr.rel (!%p10_p4) target bundleno = 1 (0x1), region = 62 }

</bundles_post_ra>
